<compile_context>
chip_gen: v7x
topology: tpu7x:2x2x1
jax: 0.10.0
libtpu: 0.0.40
codegen_flags: <defaults>
</compile_context>

<pallas_src>
import jax
import jax.numpy as jnp
from jax.experimental import pallas as pl
from jax.experimental.pallas import tpu as pltpu


def _round_up(x, m):
    return ((x + m - 1) // m) * m


def _tpu_budgets():
    """Per-generation (activation_tile_bytes, vmem_limit_bytes)."""
    vmem_cap = 64 * 1024 * 1024  # conservative default = v7x per-TC VMEM
    try:
        info = pltpu.get_tpu_info()
        cap = int(getattr(info, "vmem_capacity_bytes", 0))
        if cap > 0:
            vmem_cap = cap
    except Exception:
        pass
    if vmem_cap <= 64 * 1024 * 1024:
        # v7x: 64 MiB VMEM per TensorCore -> <=4 MiB tiles, 48 MiB scoped limit.
        return 4 * 1024 * 1024, 48 * 1024 * 1024
    # v5e / v6e: 128 MiB VMEM -> ~8 MiB tiles, 64 MiB scoped limit.
    return 8 * 1024 * 1024, 64 * 1024 * 1024


def _make_fusion_kernel(C, use_mxu):
    def kernel(x1_ref, x2_ref, w_ref, shift_ref, o_ref):
        # x1_ref/x2_ref/o_ref: (1, C, T) -- channels on sublanes, spatial lanes
        # w_ref: (C, C) BN-folded weight (Cout x Cin); shift_ref: (C, 1) f32
        x2 = x2_ref[0].astype(jnp.float32)          # epilogue in f32
        shift = shift_ref[...]                      # (C, 1), lane-broadcast
        if use_mxu:
            # Feed the activation dtype (f32 or bf16) straight to the MXU and
            # accumulate in f32 -- no VPU upcast of the streamed operand.
            y = jnp.dot(w_ref[...], x1_ref[0],
                        preferred_element_type=jnp.float32)
            y = y + shift + x2
        else:
            # Tiny channel count: skip the (mostly idle) MXU and do C broadcast
            # multiply-adds on the VPU over lane-dense (C, T) vregs, in f32
            # (v5e has no bf16 VALU).  Kernel is HBM-bound here, so these
            # VALU/XLU ops are filler under the DMA time.
            x1 = x1_ref[0].astype(jnp.float32)      # (C, T)
            w = w_ref[...]                          # (C, C) f32, tiny
            y = x2 + shift
            for k in range(C):                      # static unroll, C is tiny
                y = y + w[:, k:k + 1] * x1[k:k + 1, :]
        o_ref[0] = jnp.maximum(y, 0.0).astype(o_ref.dtype)
    return kernel


def fusion_forward(x1_nchw, x2_nchw, conv_w, conv_b, gamma, beta,
                   running_mean, running_var, eps=1e-5, max_tile_hw=None):
    N, C, H, W = x1_nchw.shape
    assert x2_nchw.shape == x1_nchw.shape
    assert conv_w.shape == (C, C, 1, 1)
    HW = H * W
    dtype = x1_nchw.dtype
    itemsize = jnp.dtype(dtype).itemsize

    # --- Fold BN (eval) into the conv weight + a per-channel shift ----------
    # BN(conv(x)) = scale*(Wx + b - mean) + beta = (scale*W) x + (scale*(b-mean)+beta)
    inv_std = 1.0 / jnp.sqrt(running_var.astype(jnp.float32) + eps)
    scale = gamma.astype(jnp.float32) * inv_std                       # (C,)
    w = conv_w[:, :, 0, 0].astype(jnp.float32)                        # (Cout, Cin)
    w_folded = w * scale[:, None]                                     # (C, C)
    shift = (conv_b.astype(jnp.float32)
             - running_mean.astype(jnp.float32)) * scale \
            + beta.astype(jnp.float32)                                # (C,)
    shift2 = shift.reshape(C, 1)

    use_mxu = C > 8
    if use_mxu and dtype == jnp.bfloat16:
        # Native bf16 MXU issue; f32 accumulation via preferred_element_type.
        w_folded = w_folded.astype(jnp.bfloat16)
    w_bytes = C * C * jnp.dtype(w_folded.dtype).itemsize

    # --- NCHW-native flatten: (N, C, H, W) -> (N, C, HW), no transpose/copy --
    x1 = x1_nchw.reshape(N, C, HW)
    x2 = x2_nchw.reshape(N, C, HW)

    # --- Tile sizing: per-generation byte budget, lane dim multiple of 128 ---
    tile_budget, vmem_limit = _tpu_budgets()
    buffer_weight_once = use_mxu and w_bytes >= (2 << 20)
    w_copies = 1 if buffer_weight_once else 2
    # Keep 3 streamed operands x 2 buffers x tile + weight copies under limit.
    avail = max(vmem_limit - w_copies * w_bytes - (1 << 20), 1 << 20)
    tile_budget = min(tile_budget, avail // 6)

    cols_cap = max(128, (tile_budget // max(C * itemsize, 1)) // 128 * 128)
    if max_tile_hw is not None:
        cols_cap = min(cols_cap, max(128, (max_tile_hw // 128) * 128))

    # Either the full spatial extent (always a legal block) or a multiple of 128.
    tile_hw = HW if HW <= cols_cap else cols_cap

    # Ensure >= 2 independent grid iterations so both v7x TensorCores get work.
    if N * pl.cdiv(HW, tile_hw) < 2 and tile_hw > 128:
        half = _round_up(pl.cdiv(HW, 2), 128)
        if pl.cdiv(HW, half) >= 2:
            tile_hw = half

    kernel = _make_fusion_kernel(C, use_mxu)

    w_spec = pl.BlockSpec((C, C), lambda n, j: (0, 0))
    if buffer_weight_once:
        # Invariant operand: don't double-buffer a multi-MiB weight.
        w_spec = pl.BlockSpec((C, C), lambda n, j: (0, 0),
                              pipeline_mode=pl.Buffered(1))

    cost = pl.CostEstimate(
        flops=2 * N * C * C * HW,
        transcendentals=0,
        bytes_accessed=3 * N * C * HW * itemsize + w_bytes + C * 4,
    )

    grid = (N, pl.cdiv(HW, tile_hw))   # both axes independent -> parallel
    out = pl.pallas_call(
        kernel,
        out_shape=jax.ShapeDtypeStruct((N, C, HW), dtype),
        grid_spec=pltpu.PrefetchScalarGridSpec(
            num_scalar_prefetch=0,
            grid=grid,
            in_specs=[
                pl.BlockSpec((1, C, tile_hw), lambda n, j: (n, 0, j)),  # x1 tile
                pl.BlockSpec((1, C, tile_hw), lambda n, j: (n, 0, j)),  # x2 tile
                w_spec,                                                 # folded W
                pl.BlockSpec((C, 1), lambda n, j: (0, 0)),              # shift
            ],
            out_specs=pl.BlockSpec((1, C, tile_hw), lambda n, j: (n, 0, j)),
        ),
        compiler_params=pltpu.CompilerParams(
            dimension_semantics=("parallel", "parallel"),
            vmem_limit_bytes=vmem_limit,
        ),
        cost_estimate=cost,
    )(x1, x2, w_folded, shift2)

    return out.reshape(N, C, H, W)


def reference_forward(x1, x2, conv_w, conv_b, gamma, beta, mean, var, eps=1e-5):
    # Plain-JAX reference (eval-mode BN), NCHW-native, f32.
    N, C, H, W = x1.shape
    w = conv_w[:, :, 0, 0].astype(jnp.float32)                        # (Cout, Cin)
    x = x1.reshape(N, C, H * W).astype(jnp.float32)
    y = jnp.einsum('oi,nip->nop', w, x) + conv_b[None, :, None]
    y = (y - mean[None, :, None]) / jnp.sqrt(var[None, :, None] + eps) \
        * gamma[None, :, None] + beta[None, :, None]
    y = y.reshape(N, C, H, W) + x2.astype(jnp.float32)
    return jnp.maximum(y, 0.0)


if __name__ == "__main__":
    key = jax.random.PRNGKey(0)

    def make_params(k, C):
        ks = jax.random.split(k, 6)
        conv_w = jax.random.normal(ks[0], (C, C, 1, 1), jnp.float32) * 0.1
        conv_b = jax.random.normal(ks[1], (C,), jnp.float32) * 0.1
        gamma = 1.0 + 0.1 * jax.random.normal(ks[2], (C,), jnp.float32)
        beta = 0.1 * jax.random.normal(ks[3], (C,), jnp.float32)
        mean = 0.1 * jax.random.normal(ks[4], (C,), jnp.float32)
        var = jnp.abs(1.0 + 0.1 * jax.random.normal(ks[5], (C,), jnp.float32))
        return conv_w, conv_b, gamma, beta, mean, var

    def run_case(k, N, C, H, W, dtype, tol, max_tile_hw=None):
        ks = jax.random.split(k, 3)
        x1 = jax.random.normal(ks[0], (N, C, H, W), jnp.float32).astype(dtype)
        x2 = jax.random.normal(ks[1], (N, C, H, W), jnp.float32).astype(dtype)
        params = make_params(ks[2], C)
        out = fusion_forward(x1, x2, *params, max_tile_hw=max_tile_hw)
        out = jax.block_until_ready(out)
        ref = reference_forward(x1, x2, *params)
        assert out.shape == (N, C, H, W)
        err = float(jnp.max(jnp.abs(out.astype(jnp.float32) - ref)))
        assert err < tol, f"mismatch {err} (N={N},C={C},H={H},W={W},{dtype})"

    keys = jax.random.split(key, 4)
    # Primary small shape (tiny-C VPU path).
    run_case(keys[0], 2, 4, 16, 16, jnp.float32, 1e-4)
    # H*W not a multiple of 128 (full-extent lane block).
    run_case(keys[1], 2, 4, 10, 20, jnp.float32, 1e-4)
    # Forced small lane tile -> masked trailing-block store path.
    run_case(keys[2], 1, 4, 16, 25, jnp.float32, 1e-4, max_tile_hw=128)
    # MXU path (C > 8) with bf16 activations fed straight to the MXU.
    run_case(keys[3], 1, 16, 8, 32, jnp.bfloat16, 1e-1)

    print("KERNEL_OK")
</pallas_src>

<mosaic_0001>
module attributes {stable_mosaic.version = 11 : i64} {
  func.func @kernel(%arg0: i32, %arg1: i32, %arg2: memref<1x4x256xf32, #tpu.memory_space<vmem>>, %arg3: memref<1x4x256xf32, #tpu.memory_space<vmem>>, %arg4: memref<4x4xf32, #tpu.memory_space<vmem>>, %arg5: memref<4x1xf32, #tpu.memory_space<vmem>>, %arg6: memref<1x4x256xf32, #tpu.memory_space<vmem>>) attributes {dimension_semantics = [#tpu.dimension_semantics<parallel>, #tpu.dimension_semantics<parallel>], iteration_bounds = array<i64: 2, 1>, scalar_prefetch = 0 : i64, scratch_operands = 0 : i64, tpu.core_type = #tpu.core_type<tc>, window_params = [{transform_indices = @transform_0, window_bounds = array<i64: 1, 4, 256>}, {transform_indices = @transform_1, window_bounds = array<i64: 1, 4, 256>}, {pipeline_mode = #tpu.pipeline_mode<synchronous>, transform_indices = @transform_2, window_bounds = array<i64: 4, 4>}, {pipeline_mode = #tpu.pipeline_mode<synchronous>, transform_indices = @transform_3, window_bounds = array<i64: 4, 1>}, {transform_indices = @transform_4, window_bounds = array<i64: 1, 4, 256>}]} {
    %c0 = arith.constant 0 : index
    %c0_0 = arith.constant 0 : index
    %c0_1 = arith.constant 0 : index
    %0 = vector.load %arg3[%c0, %c0_0, %c0_1] : memref<1x4x256xf32, #tpu.memory_space<vmem>>, vector<1x4x256xf32>
    %1 = vector.shape_cast %0 : vector<1x4x256xf32> to vector<4x256xf32>
    %c0_2 = arith.constant 0 : index
    %c0_3 = arith.constant 0 : index
    %2 = vector.load %arg5[%c0_2, %c0_3] : memref<4x1xf32, #tpu.memory_space<vmem>>, vector<4x1xf32>
    %c0_4 = arith.constant 0 : index
    %c0_5 = arith.constant 0 : index
    %c0_6 = arith.constant 0 : index
    %3 = vector.load %arg2[%c0_4, %c0_5, %c0_6] : memref<1x4x256xf32, #tpu.memory_space<vmem>>, vector<1x4x256xf32>
    %4 = vector.shape_cast %3 : vector<1x4x256xf32> to vector<4x256xf32>
    %c0_7 = arith.constant 0 : index
    %c0_8 = arith.constant 0 : index
    %5 = vector.load %arg4[%c0_7, %c0_8] : memref<4x4xf32, #tpu.memory_space<vmem>>, vector<4x4xf32>
    %6 = vector.broadcast %2 : vector<4x1xf32> to vector<4x256xf32>
    %7 = arith.addf %1, %6 : vector<4x256xf32>
    %8 = vector.extract_strided_slice %5 {offsets = [0, 0], sizes = [4, 1], strides = [1, 1]} : vector<4x4xf32> to vector<4x1xf32>
    %9 = vector.extract_strided_slice %4 {offsets = [0, 0], sizes = [1, 256], strides = [1, 1]} : vector<4x256xf32> to vector<1x256xf32>
    %10 = vector.broadcast %8 : vector<4x1xf32> to vector<4x256xf32>
    %11 = vector.broadcast %9 : vector<1x256xf32> to vector<4x256xf32>
    %12 = arith.mulf %10, %11 : vector<4x256xf32>
    %13 = arith.addf %7, %12 : vector<4x256xf32>
    %14 = vector.extract_strided_slice %5 {offsets = [0, 1], sizes = [4, 1], strides = [1, 1]} : vector<4x4xf32> to vector<4x1xf32>
    %15 = vector.extract_strided_slice %4 {offsets = [1, 0], sizes = [1, 256], strides = [1, 1]} : vector<4x256xf32> to vector<1x256xf32>
    %16 = vector.broadcast %14 : vector<4x1xf32> to vector<4x256xf32>
    %17 = vector.broadcast %15 : vector<1x256xf32> to vector<4x256xf32>
    %18 = arith.mulf %16, %17 : vector<4x256xf32>
    %19 = arith.addf %13, %18 : vector<4x256xf32>
    %20 = vector.extract_strided_slice %5 {offsets = [0, 2], sizes = [4, 1], strides = [1, 1]} : vector<4x4xf32> to vector<4x1xf32>
    %21 = vector.extract_strided_slice %4 {offsets = [2, 0], sizes = [1, 256], strides = [1, 1]} : vector<4x256xf32> to vector<1x256xf32>
    %22 = vector.broadcast %20 : vector<4x1xf32> to vector<4x256xf32>
    %23 = vector.broadcast %21 : vector<1x256xf32> to vector<4x256xf32>
    %24 = arith.mulf %22, %23 : vector<4x256xf32>
    %25 = arith.addf %19, %24 : vector<4x256xf32>
    %26 = vector.extract_strided_slice %5 {offsets = [0, 3], sizes = [4, 1], strides = [1, 1]} : vector<4x4xf32> to vector<4x1xf32>
    %27 = vector.extract_strided_slice %4 {offsets = [3, 0], sizes = [1, 256], strides = [1, 1]} : vector<4x256xf32> to vector<1x256xf32>
    %28 = vector.broadcast %26 : vector<4x1xf32> to vector<4x256xf32>
    %29 = vector.broadcast %27 : vector<1x256xf32> to vector<4x256xf32>
    %30 = arith.mulf %28, %29 : vector<4x256xf32>
    %31 = arith.addf %25, %30 : vector<4x256xf32>
    %cst = arith.constant 0.000000e+00 : f32
    %32 = vector.broadcast %cst : f32 to vector<4x256xf32>
    %33 = arith.maximumf %31, %32 : vector<4x256xf32>
    %c0_9 = arith.constant 0 : index
    %c0_10 = arith.constant 0 : index
    %c0_11 = arith.constant 0 : index
    %34 = vector.load %arg6[%c0_9, %c0_10, %c0_11] : memref<1x4x256xf32, #tpu.memory_space<vmem>>, vector<1x4x256xf32>
    %35 = vector.shape_cast %34 : vector<1x4x256xf32> to vector<4x256xf32>
    %36 = vector.shape_cast %33 : vector<4x256xf32> to vector<1x4x256xf32>
    tpu.vector_store %arg6[%c0_9, %c0_10, %c0_11], %36 {strides = array<i32>} : memref<1x4x256xf32, #tpu.memory_space<vmem>>, vector<1x4x256xf32>,
    return
  }
  func.func @transform_0(%arg0: i32, %arg1: i32) -> (i32, i32, i32) {
    %c0_i32 = arith.constant 0 : i32
    %c0_i32_0 = arith.constant 0 : i32
    return %arg0, %c0_i32, %arg1 : i32, i32, i32
  }
  func.func @transform_1(%arg0: i32, %arg1: i32) -> (i32, i32, i32) {
    %c0_i32 = arith.constant 0 : i32
    %c0_i32_0 = arith.constant 0 : i32
    return %arg0, %c0_i32, %arg1 : i32, i32, i32
  }
  func.func @transform_2(%arg0: i32, %arg1: i32) -> (i32, i32) {
    %c0_i32 = arith.constant 0 : i32
    %c0_i32_0 = arith.constant 0 : i32
    %c0_i32_1 = arith.constant 0 : i32
    return %c0_i32, %c0_i32_0 : i32, i32
  }
  func.func @transform_3(%arg0: i32, %arg1: i32) -> (i32, i32) {
    %c0_i32 = arith.constant 0 : i32
    %c0_i32_0 = arith.constant 0 : i32
    %c0_i32_1 = arith.constant 0 : i32
    return %c0_i32, %c0_i32_0 : i32, i32
  }
  func.func @transform_4(%arg0: i32, %arg1: i32) -> (i32, i32, i32) {
    %c0_i32 = arith.constant 0 : i32
    %c0_i32_0 = arith.constant 0 : i32
    return %arg0, %c0_i32, %arg1 : i32, i32, i32
  }
}

</mosaic_0001>

<bundles_post_ra>
// kernel: tpu_custom_call.1
= control target key start
LH: loop header
LB: loop body
LE: loop exit
PB: predicated region body
PF: predicated region fallthrough
CT: control target
= control target key end

     0   :  { %9 = vsyncpa [#allocation3], 0  ;;  %s1053_s0 = inlined_call_operand.hbm [shape: f32[2,4,256], index: 0, kind: input, shape index: {}]   ;;  %s1054_s1 = inlined_call_operand.hbm [shape: f32[2,4,256], index: 1, kind: input, shape index: {}]   ;;  %s1055_s2 = inlined_call_operand.vmem [shape: f32[4,4], index: 2, kind: input, shape index: {}]   ;;  %s1056_s3 = inlined_call_operand.vmem [shape: f32[4,1], index: 3, kind: input, shape index: {}]   ;;  %s1057_s4 = inlined_call_operand.hbm [shape: f32[2,4,256], index: 4, kind: output, shape index: {}]  }
   0x1   :  { %11 = vsyncpa [#allocation3 + $0x1], 0 }
   0x2   :  { %12 = vsyncpa [#allocation6], 0 }
   0x3   :  { %14 = vsyncpa [#allocation6 + $0x1], 0 }
   0x4   :  { %15 = vsyncpa [#allocation4], 0 }
   0x5   :  { %17 = vsyncpa [#allocation4 + $0x1], 0  ;;  %s820_s15 = smov 0   ;;  %s822_s16 = smov 0  }
   0x6   :  { %s824_s17 = smov 0   ;;  %s826_s18 = smov 0  }
   0x7   :  { %s828_s19 = smov 0   ;;  %s830_s20 = smov 0  }
   0x8 LB: > { %s541_s21 = sadd.s32 4294967295, %s785_s20   ;;  %s542_s22 = sadd.s32 4294967294, %s785_s20   ;;  %s785_s20 = sphi %s830_s20, %s23_s20   ;;  %s781_s19 = sphi %s828_s19, %s1077_s19   ;;  %s777_s18 = sphi %s826_s18, %s1076_s18   ;;  %s773_s17 = sphi %s824_s17, %s1075_s17   ;;  %s769_s16 = sphi %s822_s16, %s1074_s16   ;;  %s765_s15 = sphi %s820_s15, %s1073_s15  }
   0x9   : > { %s35_s23 = sadd.s32 1, %s781_s19  ;;  %s44_s24 = sadd.s32 1, %s773_s17 }
   0xa   : > { %p37_p0 = scmp.ge.s32.totalorder %s35_s23, 2  ;;  %p51_p1 = scmp.ne.s32.totalorder %s773_s17, %s769_s16 }
   0xb   : > { %p52_p2 = scmp.eq.s32.totalorder %s785_s20, 0  ;;  %p57_p3 = scmp.ne.s32.totalorder %s769_s16, %s765_s15 }
   0xc   : > { %s1079_s23 = smov (%p37_p0, %s35_s23), 0  ;;  %p58_p5 = scmp.eq.s32.totalorder %s541_s21, 0 }
   0xd   : > { %p861_p4 = por %p52_p2, %p51_p1  ;;  %s39_s26 = ssub.s32 %s781_s19, %s1079_s23 }
   0xe   : > { %p153_p6 = scmp.eq.s32.totalorder %s541_s21, 1  ;;  %p42_p7 = scmp.eq.s32.totalorder %s39_s26, 0 }
   0xf   : > { %p867_p8 = por %p58_p5, %p57_p3  ;;  %p159_p10 = scmp.eq.s32.totalorder %s542_s22, 1 }
  0x10   : > { %p871_p9 = por %p153_p6, %p51_p1  ;;  %p580_p13 = scmp.lt.s32.totalorder %s785_s20, 2 }
  0x11   : > { %s1061_s27 = scalar_select %p867_p8, 1, 0 }
  0x12   : > { %s1062_s28 = scalar_select %p871_p9, 1, 0 }
  0x13   : > { %s876_s29 = scalar_select %p42_p7, %s773_s17, %s44_s24  }
  0x14   : > { %p878_p11 = por %p159_p10, %p57_p3  ;;  %s885_s5 = sand.u32 1, %s773_s17  }
  0x15   : > { %s545_s6 = sshll.u32 %s885_s5, 3  ;;  %s560_s7 = sshll.u32 %s781_s19, 7 }
  0x16   : > { %s1063_s30 = scalar_select %p878_p11, 1, 0 }
  0x17   : > { %s894_s10 = scalar_lea.hbm %s1053_s0, %s560_s7  ;;  %s189_s11 = scalar_lea.vmem [#allocation2], %s545_s6 }
  0x18   : > { %s199_s12 = sshll.u32 %s189_s11, 4  ;;  %p902_p0 = pnand %p580_p13, %p861_p4  ;;  %s898_s12 = int_to_ptr.vmem [resolvable:$true] %s199_s12 }
  0x19   : > { %s186_s14 = scalar_lea.sflag [#allocation3], %s885_s5  ;;  %s639_s21 = scalar_lea.hbm %s894_s10, 128 }
  0x1a   : > { %p640_p3 = scmp.ne.s32.totalorder %s894_s10, %s639_s21  ;;  %p641_p5 = pneg %p902_p0 }
  0x1b   : > { %s644_s25 = scalar_lea.hbm %s1053_s0, 256  ;;  %p645_p4 = scmp.lt.u32.totalorder %s894_s10, %s1053_s0 }
  0x1c   : > { %p642_p6 = pnand %p641_p5, %p640_p3  ;;  %p646_p10 = scmp.lt.u32.totalorder %s644_s25, %s639_s21 }
  0x1d   : > { %p648_p12 = scmp.lt.u32.totalorder %s639_s21, %s894_s10 }
  0x1e   : > { %p643_p7 = pneg %p642_p6  ;;  %p647_p13 = por %p646_p10, %p645_p4 }
  0x20   : > { %p649_p1 = por %p648_p12, %p647_p13 }
  0x22   : > { %p650_p2 = pnand %p649_p1, %p643_p7 }
  0x24   : > { %653 = shalt.err (!%p650_p2)
}
  0x25   : > { %s654_s9 = scalar_lea.vmem %s898_s12, 128  ;;  %s787_s11 = smov [#allocation2]  }
  0x26   : > { %p655_p3 = scmp.ne.s32.totalorder %s898_s12, %s654_s9  ;;  %s659_s22 = sshll.u32 %s787_s11, 4  ;;  %s660_s22 = int_to_ptr.vmem [resolvable:$false] %s659_s22 }
  0x27   : > { %s661_s24 = scalar_lea.vmem %s660_s22, 256  ;;  %p662_p9 = scmp.lt.s32.totalorder %s898_s12, %s660_s22 }
  0x28   : > { %p657_p6 = pnand %p655_p3, %p641_p5  ;;  %p663_p4 = scmp.lt.s32.totalorder %s661_s24, %s654_s9 }
  0x2a   : > { %p658_p11 = pneg %p657_p6  ;;  %p664_p10 = por %p663_p4, %p662_p9 }
  0x2c   : > { %p665_p12 = pnand %p664_p10, %p658_p11 }
  0x2e   : > { %668 = shalt.err (!%p665_p12)
}
  0x2f   : > { %572 = dma.hbm_to_vmem [thread:$0]  (!%p902_p0), %s894_s10, 128, %s898_s12, %s186_s14  }
  0x30   : > { %p1065_p1 = scmp.lt.s32.totalorder %s785_s20, 3  ;;  %p1066_p2 = scmp.ge.s32.totalorder %s785_s20, 1 }
  0x31   : > { %s947_s8 = scalar_lea.hbm %s1054_s1, %s560_s7  ;;  %s210_s9 = scalar_lea.vmem [#allocation5], %s545_s6 }
  0x32   : > { %p938_p7 = pnand %p1066_p2, %p1065_p1  ;;  %s220_s11 = sshll.u32 %s210_s9, 4  ;;  %s221_s11 = int_to_ptr.vmem [resolvable:$true] %s220_s11 }
  0x33   : > { %s207_s10 = scalar_lea.sflag [#allocation6], %s885_s5  ;;  %s669_s12 = scalar_lea.hbm %s947_s8, 128 }
  0x34   : > { %s1067_s21 = scalar_select %p938_p7, 1, 0 }
  0x35   : > { %p670_p9 = scmp.ne.s32.totalorder %s947_s8, %s669_s12  ;;  %s674_s7 = scalar_lea.hbm %s1054_s1, 256 }
  0x36   : > { %p675_p3 = scmp.lt.u32.totalorder %s947_s8, %s1054_s1  ;;  %p676_p6 = scmp.lt.u32.totalorder %s674_s7, %s669_s12 }
  0x37   : > { %p672_p11 = pnand %p670_p9, %p641_p5  ;;  %p678_p10 = scmp.lt.u32.totalorder %s669_s12, %s947_s8 }
  0x38   : > { %p677_p4 = por %p676_p6, %p675_p3 }
  0x39   : > { %p673_p13 = pneg %p672_p11 }
  0x3a   : > { %p679_p12 = por %p678_p10, %p677_p4 }
  0x3c   : > { %p680_p1 = pnand %p679_p12, %p673_p13 }
  0x3e   : > { %683 = shalt.err (!%p680_p1)
}
  0x3f   : > { %s684_s5 = scalar_lea.vmem %s221_s11, 128  ;;  %s788_s6 = smov [#allocation5]  }
  0x40   : > { %p685_p2 = scmp.ne.s32.totalorder %s221_s11, %s684_s5  ;;  %s689_s26 = sshll.u32 %s788_s6, 4  ;;  %s690_s26 = int_to_ptr.vmem [resolvable:$false] %s689_s26 }
  0x41   : > { %s691_s9 = scalar_lea.vmem %s690_s26, 256  ;;  %p692_p8 = scmp.lt.s32.totalorder %s221_s11, %s690_s26 }
  0x42   : > { %p687_p9 = pnand %p685_p2, %p641_p5  ;;  %p693_p7 = scmp.lt.s32.totalorder %s691_s9, %s684_s5 }
  0x44   : > { %p688_p11 = pneg %p687_p9  ;;  %p694_p3 = por %p693_p7, %p692_p8 }
  0x46   : > { %p695_p6 = pnand %p694_p3, %p688_p11 }
  0x48   : > { %698 = shalt.err (!%p695_p6)
}
  0x49   : > { %575 = dma.hbm_to_vmem [thread:$0]  (!%p902_p0), %s947_s8, 128, %s221_s11, %s207_s10  }
  0x4a   : > { %p1068_p13 = scmp.ne.s32.totalorder %s1067_s21, 0 }
  0x4b   : > { %s974_s12 = sand.u32 (!%p1068_p13), 1, %s769_s16   ;;  %p1069_p8 = scmp.ne.s32.totalorder (!%p1068_p13), %s1061_s27, 0 }
  0x4c   : > { %229 = sbr.rel (%p1068_p13) target bundleno = 248 (0xf8), region = 36  ;;  %s977_s14 = sshll.u32 (!%p1068_p13), %s974_s12, 3 }
  0x4d   : > { %s232_s22 = scalar_lea.sflag (!%p1068_p13), [#allocation3], %s974_s12  ;;  %s235_s7 = scalar_lea.vmem (!%p1068_p13), [#allocation2], %s977_s14 }
  0x53   : > { %752 = dma.done.wait (%p1069_p8), %s232_s22, 128  }
  0x54   : > { %754 = vsyncadd (%p1069_p8), %s232_s22, 4294967168  ;;  %s241_s13 = scalar_lea.sflag [#allocation6], %s974_s12  ;;  %s244_s21 = scalar_lea.vmem [#allocation5], %s977_s14 }
  0x55   : > { %756 = dma.done.wait (%p1069_p8), %s241_s13, 128  }
  0x56   : > { %758 = vsyncadd (%p1069_p8), %s241_s13, 4294967168  ;;  %v789_v0 = vmov 0   ;;  %v790_v1 = vmov 1   ;;  %v278_v2 = vld [vmem:[%s1056_s3] sm:$0xf]  ;;  %v791_v4 = vmov 2   ;;  %v288_v6 = vlaneseq }
  0x57   : > { %635 = vset.pattern.permute.xlu0 %v789_v0  ;;  %636 = vset.pattern.permute.xlu1 %v790_v1  ;;  %v280_v3 = vld [vmem:[%s1055_s2] sm:$0xf]  ;;  %v792_v5 = vmov 3   ;;  %v793_v8 = vmov 839922192   ;;  %v277_v38 = vld [vmem:[%s244_s21] sm:$0xff] }
  0x58   : > { %283 = vperm.xlu0 %635, %v278_v2   ;;  %326 = vperm.xlu1 %636, %v280_v3   ;;  %v289_v7 = vshrl.u32 %v288_v6, 7  ;;  %v286_v9 = vunpack.c.l.s4 %v793_v8  ;;  %v279_v14 = vld [vmem:[%s235_s7] sm:$0xff]  ;;  %s562_s27 = sshll.u32 %s777_s18, 7  ;;  %s273_s25 = scalar_lea.vmem [#allocation7], %s977_s14 }
  0x59   : > { %s431_s5 = sshll.u32 %s273_s25, 4  ;;  %s1004_s9 = scalar_lea.hbm %s1057_s4, %s562_s27  ;;  %s1006_s5 = int_to_ptr.vmem [resolvable:$true] %s431_s5 }
  0x5a   : > { %v331_v10 = vsub.s32 1, %v289_v7  ;;  %v335_v11 = vsub.s32 5, %v289_v7  ;;  %v302_v12 = vsub.s32 0, %v289_v7  ;;  %v306_v13 = vsub.s32 4, %v289_v7  ;;  %s415_s22 = scalar_lea.sflag [#allocation4], %s974_s12  ;;  %s699_s7 = scalar_lea.vmem %s1006_s5, 128 }
  0x5b   : > { %v360_v15 = vsub.s32 2, %v289_v7  ;;  %v364_v16 = vsub.s32 6, %v289_v7  ;;  %v287_v17 = vunpack.c.0.s8 %v286_v9  ;;  %v389_v24 = vsub.s32 3, %v289_v7  ;;  %p700_p0 = scmp.ne.s32.totalorder %s1006_s5, %s699_s7  ;;  %p1070_p5 = scmp.ne.s32.totalorder %s1062_s28, 0 }
  0x5c   : > { %296 = vperm.xlu0 %635, %v280_v3   ;;  %637 = vset.pattern.permute.xlu1 %v791_v4  ;;  %v332_v18 = vrot.slane %v279_v14, %v331_v10  ;;  %v336_v19 = vrot.slane %v279_v14, %v335_v11  ;;  %v303_v20 = vrot.slane %v279_v14, %v302_v12  ;;  %v393_v25 = vsub.s32 7, %v289_v7  ;;  %s794_s18 = smov [#allocation7]  }
  0x5d   : > { %355 = vperm.xlu1 %637, %v280_v3   ;;  %v307_v21 = vrot.slane %v279_v14, %v306_v13  ;;  %v361_v22 = vrot.slane %v279_v14, %v360_v15  ;;  %v365_v23 = vrot.slane %v279_v14, %v364_v16  ;;  %v290_v26 = vsub.s32 %v287_v17, %v289_v7  ;;  %p701_p7 = pnand %p700_p0, %p1070_p5  ;;  %s703_s14 = sshll.u32 %s794_s18, 4  ;;  %s704_s14 = int_to_ptr.vmem [resolvable:$false] %s703_s14 }
  0x5e   : > { %v342_v29 = vrot.slane %v332_v18, %v331_v10  ;;  %v346_v30 = vrot.slane %v336_v19, %v331_v10  ;;  %v313_v31 = vrot.slane %v303_v20, %v302_v12  ;;  %v390_v35 = vrot.slane %v279_v14, %v389_v24  ;;  %s705_s13 = scalar_lea.vmem %s704_s14, 256  ;;  %p706_p10 = scmp.lt.s32.totalorder %s1006_s5, %s704_s14 }
  0x5f   : > { %v317_v32 = vrot.slane %v307_v21, %v302_v12  ;;  %v371_v33 = vrot.slane %v361_v22, %v360_v15  ;;  %v375_v34 = vrot.slane %v365_v23, %v360_v15  ;;  %v394_v36 = vrot.slane %v279_v14, %v393_v25  ;;  %p702_p4 = pneg %p701_p7  ;;  %p707_p12 = scmp.lt.s32.totalorder %s705_s13, %s699_s7 }
  0x60   : > { %638 = vset.pattern.permute.xlu0 %v792_v5  ;;  %v400_v47 = vrot.slane %v390_v35, %v389_v24 }
  0x61   : > { %384 = vperm.xlu0 %638, %v280_v3   ;;  %v404_v48 = vrot.slane %v394_v36, %v389_v24  ;;  %p708_p1 = por %p707_p12, %p706_p10 }
  0x63   : > { %p709_p2 = pnand %p708_p1, %p702_p4 }
  0xd7   : > { %v284_v27 = vpop.permute.xlu0 %283  ;;  %v327_v28 = vpop.permute.xlu1 %326 }
  0xd8   : > { %v291_v37 = vrot.slane %v284_v27, %v290_v26  ;;  %v347_v40 = vmul.f32 %v342_v29, %v327_v28  ;;  %v348_v41 = vmul.f32 %v346_v30, %v327_v28 }
  0xda   : > { %v293_v49 = vadd.f32 %v291_v37, %v277_v38  ;;  %v351_v51 = vcombine.low %v347_v40, %v348_v41 }
  0xdb   : > { %v297_v39 = vpop.permute.xlu0 %296 }
  0xdc   : > { %v318_v42 = vmul.f32 %v313_v31, %v297_v39  ;;  %v319_v43 = vmul.f32 %v317_v32, %v297_v39  ;;  %v356_v44 = vpop.permute.xlu1 %355 }
  0xdd   : > { %v376_v45 = vmul.f32 %v371_v33, %v356_v44  ;;  %v377_v46 = vmul.f32 %v375_v34, %v356_v44 }
  0xde   : > { %v322_v50 = vcombine.low %v318_v42, %v319_v43 }
  0xdf   : > { %v380_v53 = vcombine.low %v376_v45, %v377_v46 }
  0xe0   : > { %v324_v52 = vadd.f32 %v322_v50, %v293_v49  ;;  %v385_v54 = vpop.permute.xlu0 %384 }
  0xe1   : > { %v405_v55 = vmul.f32 %v400_v47, %v385_v54  ;;  %v406_v56 = vmul.f32 %v404_v48, %v385_v54 }
  0xe2   : > { %v353_v57 = vadd.f32 %v351_v51, %v324_v52 }
  0xe3   : > { %v409_v58 = vcombine.low %v405_v55, %v406_v56 }
  0xe4   : > { %v382_v59 = vadd.f32 %v380_v53, %v353_v57 }
  0xe6   : > { %v411_v60 = vadd.f32 %v409_v58, %v382_v59 }
  0xe8   : > { %v412_v61 = vmax.f32 %v411_v60, 0.0 }
  0xea   : > { %413 = vst [vmem:[%s273_s25] sm:$0xff] %v412_v61 }
  0xeb   : > { %712 = shalt.err (!%p709_p2)
}
  0xec   : > { %s713_s12 = scalar_lea.hbm %s1004_s9, 128  ;;  %s717_s11 = scalar_lea.hbm %s1057_s4, 256 }
  0xed   : > { %p714_p9 = scmp.ne.s32.totalorder %s1004_s9, %s713_s12  ;;  %p718_p6 = scmp.lt.u32.totalorder %s1004_s9, %s1057_s4 }
  0xee   : > { %p719_p13 = scmp.lt.u32.totalorder %s717_s11, %s713_s12  ;;  %p721_p0 = scmp.lt.u32.totalorder %s713_s12, %s1004_s9 }
  0xef   : > { %p715_p11 = pnand %p714_p9, %p1070_p5 }
  0xf0   : > { %p720_p8 = por %p719_p13, %p718_p6 }
  0xf1   : > { %p716_p3 = pneg %p715_p11 }
  0xf2   : > { %p722_p7 = por %p721_p0, %p720_p8 }
  0xf4   : > { %p723_p4 = pnand %p722_p7, %p716_p3 }
  0xf6   : > { %726 = shalt.err (!%p723_p4)
}
  0xf7   : > { %567 = dma.vmem_to_hbm [thread:$0]  (%p1070_p5), %s1006_s5, 128, %s1004_s9, %s415_s22  }
  0xf8 PF: > { %s443_s27 = sand.u32 1, %s765_s15   ;;  %p1071_p10 = scmp.ne.s32.totalorder %s1063_s30, 0 }
  0xf9   : > { %p1072_p12 = scmp.ge.s32.totalorder %s785_s20, 2  ;;  %s444_s25 = scalar_lea.sflag [#allocation4], %s443_s27 }
  0xfb   : > { %p577_p1 = pnand %p1072_p12, %p1071_p10 }
  0xfd   : > { %760 = dma.done.wait (!%p577_p1), %s444_s25, 128  }
  0xfe   : > { %762 = vsyncadd (!%p577_p1), %s444_s25, 4294967168  ;;  %s23_s20 = sadd.s32 1, %s785_s20   ;;  %s1073_s15 = smov %s769_s16 }
  0xff   : > { %p20_p2 = scmp.ge.s32.totalorder %s23_s20, 4   ;;  %s1074_s16 = smov %s773_s17 }
 0x100   : > { %s1075_s17 = smov %s876_s29  ;;  %s1076_s18 = smov %s781_s19 }
 0x101   : > { %s1077_s19 = smov %s1079_s23  ;;  %22 = sbr.rel (!%p20_p2) target bundleno = 8 (0x8), region = 94 }
 0x108   :  { %449 = vsyncpa [#allocation3], 1 }
 0x109   :  { %451 = vsyncpa [#allocation3 + $0x1], 1 }
 0x10a   :  { %452 = vsyncpa [#allocation6], 1 }
 0x10b   :  { %454 = vsyncpa [#allocation6 + $0x1], 1 }
 0x10c   :  { %455 = vsyncpa [#allocation4], 1 }
 0x10d   :  { %457 = vsyncpa [#allocation4 + $0x1], 1 }

</bundles_post_ra>
